<compile_context>
chip_gen: v7x
topology: tpu7x:2x2x1
jax: 0.10.0
libtpu: 0.0.40
codegen_flags: <defaults>
</compile_context>

<pallas_src>
import math
import functools

import jax
import jax.numpy as jnp
from jax.experimental import pallas as pl
from jax.experimental.pallas import tpu as pltpu

LANE = 128
MAX_LANE_WIDTH = 4096           # slab lane width cap (multiple of 128)
TARGET_BLOCK_BYTES = 2 << 20    # ~2 MiB per block buffer (see VMEM budget above)


# ----------------------------- geometry ------------------------------------ #

def _slab_geometry(numel, itemsize):
    """Pick a lane-dense slab (rows, W) plus a row-block size.

    W is a multiple of 128 that divides numel whenever numel % 128 == 0, so the
    common case requires no padding (reshape only, which XLA treats as free).
    """
    if numel % LANE == 0:
        k = numel // LANE
        w = LANE * math.gcd(k, MAX_LANE_WIDTH // LANE)
    else:
        # Rare fallback: numel not a multiple of 128 -> small zero pad.
        w = min(MAX_LANE_WIDTH, LANE * (-(-numel // LANE)))
    padded = (-(-numel // w)) * w
    rows = padded // w

    target_rows = max(1, TARGET_BLOCK_BYTES // (w * itemsize))
    if rows <= target_rows:
        block_rows = rows                      # full extent -> always legal
    else:
        block_rows = max(8, (target_rows // 8) * 8)   # multiple of 8 sublanes
    return w, rows, block_rows, padded


# ----------------------------- kernels ------------------------------------- #

def _abs_sum_kernel(x_ref, o_ref, acc_ref, *, total_rows, block_rows, need_mask):
    """Grid reduction: sum(|x|) with a block-shaped VMEM accumulator.

    Steady state is elementwise abs + add only (VALU work hidden under the
    HBM stream); the single cross-lane reduce to a (1, 1) scalar happens in the
    final pl.when.
    """
    i = pl.program_id(0)

    @pl.when(i == 0)
    def _():
        acc_ref[...] = jnp.zeros_like(acc_ref)

    vals = jnp.abs(x_ref[...].astype(jnp.float32))
    if need_mask:  # statically gated: only emitted when rows % block_rows != 0
        row_ids = i * block_rows + jax.lax.broadcasted_iota(
            jnp.int32, vals.shape, 0)
        vals = jnp.where(row_ids < total_rows, vals, 0.0)
    acc_ref[...] += vals

    @pl.when(i == pl.num_programs(0) - 1)
    def _():
        o_ref[...] = jnp.sum(acc_ref[...], keepdims=True)


def _quant_kernel(s_ref, x_ref, o_ref, *, psumq_bits):
    """Elementwise LSQ quantization; scalars [s, 1/s] prefetched into SMEM."""
    s = s_ref[0]
    x = x_ref[...].astype(jnp.float32)
    if psumq_bits == 1:
        # LSQ_binary.forward: sign(x/s)*s; s = 2*mean|x| >= 0 so sign(x/s)==sign(x).
        o_ref[...] = (jnp.sign(x) * s).astype(o_ref.dtype)
    else:
        inv_s = s_ref[1]                       # exact IEEE 1/s from the wrapper
        qn = -(2.0 ** (psumq_bits - 1))
        qp = 2.0 ** (psumq_bits - 1) - 1.0
        vbar = jnp.round(jnp.clip(x * inv_s, qn, qp))  # round-half-to-even
        o_ref[...] = (vbar * s).astype(o_ref.dtype)


# ----------------------------- pallas wrappers ------------------------------ #

def _abs_sum(x2d, block_rows):
    rows, w = x2d.shape
    grid = (pl.cdiv(rows, block_rows),)
    need_mask = (rows % block_rows) != 0
    kernel = functools.partial(_abs_sum_kernel, total_rows=rows,
                               block_rows=block_rows, need_mask=need_mask)
    out = pl.pallas_call(
        kernel,
        out_shape=jax.ShapeDtypeStruct((1, 1), jnp.float32),
        grid_spec=pltpu.PrefetchScalarGridSpec(
            num_scalar_prefetch=0,
            grid=grid,
            in_specs=[pl.BlockSpec((block_rows, w), lambda i: (i, 0))],
            out_specs=pl.BlockSpec((1, 1), lambda i: (0, 0)),
            scratch_shapes=[pltpu.VMEM((block_rows, w), jnp.float32)],
        ),
        compiler_params=pltpu.CompilerParams(
            dimension_semantics=("arbitrary",)),
    )(x2d)
    return out[0, 0]


def _quantize(x2d, scalars, psumq_bits, block_rows):
    rows, w = x2d.shape
    grid = (pl.cdiv(rows, block_rows),)
    kernel = functools.partial(_quant_kernel, psumq_bits=psumq_bits)
    return pl.pallas_call(
        kernel,
        out_shape=jax.ShapeDtypeStruct(x2d.shape, x2d.dtype),
        grid_spec=pltpu.PrefetchScalarGridSpec(
            num_scalar_prefetch=1,             # [s, 1/s] -> SMEM
            grid=grid,
            in_specs=[pl.BlockSpec((block_rows, w), lambda i, s: (i, 0))],
            out_specs=pl.BlockSpec((block_rows, w), lambda i, s: (i, 0)),
        ),
        compiler_params=pltpu.CompilerParams(
            dimension_semantics=("parallel",)),
    )(scalars, x2d)


# ----------------------------- module -------------------------------------- #

class PartialSumLSQ:
    """JAX/Pallas equivalent of the PyTorch PartialSumLSQ module (forward only)."""

    def __init__(self, psumq_bits, dsf_bits):
        self.psumq_bits = int(psumq_bits)
        self.dsf_bits = int(dsf_bits)          # `k` is unused in the forward pass
        # Parameter(torch.Tensor(1)) is uninitialized in torch; init deterministically.
        self.step_size = jnp.ones((), jnp.float32)
        self.init_state = 0

    def __call__(self, x):
        orig_shape = x.shape
        orig_dtype = x.dtype
        numel = int(x.size)
        itemsize = jnp.dtype(orig_dtype).itemsize
        w, rows, block_rows, padded = _slab_geometry(numel, itemsize)

        x_flat = x.reshape(-1)                 # reshape only: no HBM copy
        if padded != numel:
            # Rare fallback; padded zeros contribute 0 to sum(|x|) and we divide
            # by the true numel, so the mean is exact.
            x_flat = jnp.pad(x_flat, (0, padded - numel))
        x2d = x_flat.reshape(rows, w)

        if self.init_state == 0:
            total = _abs_sum(x2d, block_rows)
            mean_abs = total / jnp.float32(numel)
            if self.psumq_bits == 1:
                s = 2.0 * mean_abs
            else:
                s = 2.0 * mean_abs / math.sqrt(2 ** self.psumq_bits - 1)
            self.step_size = s.astype(jnp.float32)
            self.init_state = 1

        s = self.step_size
        scalars = jnp.stack([s, 1.0 / s]).astype(jnp.float32)   # exact scalar 1/s
        xq2d = _quantize(x2d, scalars, self.psumq_bits, block_rows)

        if padded == numel:
            return xq2d.reshape(orig_shape)
        return xq2d.reshape(-1)[:numel].reshape(orig_shape)


# ----------------------------- reference ----------------------------------- #

def _ref_forward(x, psumq_bits):
    x = x.astype(jnp.float32)
    mean_abs = jnp.mean(jnp.abs(x))
    if psumq_bits == 1:
        s = 2.0 * mean_abs
        return jnp.sign(x / s) * s
    s = 2.0 * mean_abs / math.sqrt(2 ** psumq_bits - 1)
    qn = -(2 ** (psumq_bits - 1))
    qp = 2 ** (psumq_bits - 1) - 1
    return jnp.round(jnp.clip(x / s, qn, qp)) * s


# ------------------------------- main --------------------------------------- #

if __name__ == "__main__":
    key = jax.random.PRNGKey(0)

    # 1) Typical small partial-sum tensor, NCHW, multi-bit path.
    x = jax.random.normal(key, (2, 4, 16, 16), dtype=jnp.float32)
    mod = PartialSumLSQ(psumq_bits=4, dsf_bits=8)
    out = jax.block_until_ready(mod(x))
    ref = _ref_forward(x, 4)
    assert out.shape == x.shape and out.dtype == x.dtype
    assert jnp.allclose(out, ref, rtol=1e-5, atol=1e-5), "multi-bit mismatch"

    # 2) Binary path (psumq_bits == 1, LSQ_binary.forward).
    mod_bin = PartialSumLSQ(psumq_bits=1, dsf_bits=8)
    out_bin = jax.block_until_ready(mod_bin(x))
    ref_bin = _ref_forward(x, 1)
    assert jnp.allclose(out_bin, ref_bin, rtol=1e-5, atol=1e-5), "binary mismatch"

    # 3) Larger tensor: exercises multi-block grid + masked last block in the
    #    reduction (rows not a multiple of block_rows), still pad-free.
    key2 = jax.random.PRNGKey(1)
    x_big = jax.random.normal(key2, (4, 32, 64, 72), dtype=jnp.float32)
    mod_big = PartialSumLSQ(psumq_bits=4, dsf_bits=8)
    out_big = jax.block_until_ready(mod_big(x_big))
    ref_big = _ref_forward(x_big, 4)
    assert jnp.allclose(out_big, ref_big, rtol=1e-5, atol=1e-5), "big mismatch"

    # 4) Odd element count: exercises the pad/slice fallback path.
    key3 = jax.random.PRNGKey(2)
    x_odd = jax.random.normal(key3, (3, 5, 7, 11), dtype=jnp.float32)
    mod_odd = PartialSumLSQ(psumq_bits=3, dsf_bits=8)
    out_odd = jax.block_until_ready(mod_odd(x_odd))
    ref_odd = _ref_forward(x_odd, 3)
    assert out_odd.shape == x_odd.shape
    assert jnp.allclose(out_odd, ref_odd, rtol=1e-5, atol=1e-5), "odd mismatch"

    print("KERNEL_OK")
</pallas_src>

<mosaic_0001>
module attributes {stable_mosaic.version = 11 : i64} {
  func.func @_abs_sum_kernel(%arg0: i32, %arg1: memref<1x2048xf32, #tpu.memory_space<vmem>>, %arg2: memref<1x1xf32, #tpu.memory_space<vmem>>, %arg3: memref<1x2048xf32, #tpu.memory_space<vmem>>) attributes {dimension_semantics = [#tpu.dimension_semantics<arbitrary>], iteration_bounds = array<i64: 1>, scalar_prefetch = 0 : i64, scratch_operands = 1 : i64, tpu.core_type = #tpu.core_type<tc>, window_params = [{transform_indices = @transform_0, window_bounds = array<i64: 1, 2048>}, {pipeline_mode = #tpu.pipeline_mode<synchronous>, transform_indices = @transform_1, window_bounds = array<i64: 1, 1>}]} {
    %c0_i32 = arith.constant 0 : i32
    %0 = arith.cmpi eq, %arg0, %c0_i32 : i32
    %1 = arith.extui %0 : i1 to i32
    %c0_i32_0 = arith.constant 0 : i32
    %2 = arith.cmpi ne, %1, %c0_i32_0 : i32
    scf.if %2 {
      %cst = arith.constant 0.000000e+00 : f32
      %11 = vector.broadcast %cst : f32 to vector<1x2048xf32>
      %c0_8 = arith.constant 0 : index
      %c0_9 = arith.constant 0 : index
      %12 = vector.load %arg3[%c0_8, %c0_9] : memref<1x2048xf32, #tpu.memory_space<vmem>>, vector<1x2048xf32>
      tpu.vector_store %arg3[%c0_8, %c0_9], %11 {strides = array<i32>} : memref<1x2048xf32, #tpu.memory_space<vmem>>, vector<1x2048xf32>,
    } else {
    }
    %c0 = arith.constant 0 : index
    %c0_1 = arith.constant 0 : index
    %3 = vector.load %arg1[%c0, %c0_1] : memref<1x2048xf32, #tpu.memory_space<vmem>>, vector<1x2048xf32>
    %4 = math.absf %3 : vector<1x2048xf32>
    %c0_2 = arith.constant 0 : index
    %c0_3 = arith.constant 0 : index
    %5 = vector.load %arg3[%c0_2, %c0_3] : memref<1x2048xf32, #tpu.memory_space<vmem>>, vector<1x2048xf32>
    %6 = arith.addf %5, %4 : vector<1x2048xf32>
    %c0_4 = arith.constant 0 : index
    %c0_5 = arith.constant 0 : index
    %7 = vector.load %arg3[%c0_4, %c0_5] : memref<1x2048xf32, #tpu.memory_space<vmem>>, vector<1x2048xf32>
    tpu.vector_store %arg3[%c0_4, %c0_5], %6 {strides = array<i32>} : memref<1x2048xf32, #tpu.memory_space<vmem>>, vector<1x2048xf32>,
    %c0_i32_6 = arith.constant 0 : i32
    %8 = arith.cmpi eq, %arg0, %c0_i32_6 : i32
    %9 = arith.extui %8 : i1 to i32
    %c0_i32_7 = arith.constant 0 : i32
    %10 = arith.cmpi ne, %9, %c0_i32_7 : i32
    scf.if %10 {
      %c0_8 = arith.constant 0 : index
      %c0_9 = arith.constant 0 : index
      %11 = vector.load %arg3[%c0_8, %c0_9] : memref<1x2048xf32, #tpu.memory_space<vmem>>, vector<1x2048xf32>
      %12 = vector.shape_cast %11 : vector<1x2048xf32> to vector<1x1x2048xf32>
      %cst = arith.constant dense<0.000000e+00> : vector<1xf32>
      %13 = vector.multi_reduction <add>, %12, %cst [1, 2] : vector<1x1x2048xf32> to vector<1xf32>
      %14 = vector.shape_cast %13 : vector<1xf32> to vector<1x1x1xf32>
      %15 = vector.extract %14[0, 0, 0] : f32 from vector<1x1x1xf32>
      %16 = vector.broadcast %15 : f32 to vector<1x1xf32>
      %c0_10 = arith.constant 0 : index
      %c0_11 = arith.constant 0 : index
      %17 = vector.load %arg2[%c0_10, %c0_11] : memref<1x1xf32, #tpu.memory_space<vmem>>, vector<1x1xf32>
      tpu.vector_store %arg2[%c0_10, %c0_11], %16 {strides = array<i32>} : memref<1x1xf32, #tpu.memory_space<vmem>>, vector<1x1xf32>,
    } else {
    }
    return
  }
  func.func @transform_0(%arg0: i32) -> (i32, i32) {
    %c0_i32 = arith.constant 0 : i32
    %c0_i32_0 = arith.constant 0 : i32
    return %arg0, %c0_i32 : i32, i32
  }
  func.func @transform_1(%arg0: i32) -> (i32, i32) {
    %c0_i32 = arith.constant 0 : i32
    %c0_i32_0 = arith.constant 0 : i32
    %c0_i32_1 = arith.constant 0 : i32
    return %c0_i32, %c0_i32_0 : i32, i32
  }
}

</mosaic_0001>

<bundles_post_ra>
// kernel: tpu_custom_call.1
= control target key start
LH: loop header
LB: loop body
LE: loop exit
PB: predicated region body
PF: predicated region fallthrough
CT: control target
= control target key end

     0   :  { %6 = vsyncpa [#allocation4], 0  ;;  %s287_s0 = inlined_call_operand.hbm [shape: f32[1,2048], index: 0, kind: input, shape index: {}]   ;;  %s288_s1 = inlined_call_operand.hbm [shape: f32[1,1], index: 1, kind: output, shape index: {}]  }
   0x1   :  { %7 = vsyncpa [#allocation5], 0  ;;  %s235_s6 = smov [#allocation3]   ;;  %s187_s10 = scalar_lea.hbm %s287_s0, 256 }
   0x2   :  { %s14_s7 = sshll.u32 %s235_s6, 4  ;;  %p188_p0 = scmp.ne.s32.totalorder %s287_s0, %s187_s10  ;;  %s15_s7 = int_to_ptr.vmem [resolvable:$true] %s14_s7 }
   0x3   :  { %p191_p1 = scmp.lt.u32.totalorder %s187_s10, %s287_s0 }
   0x5   :  { %p193_p2 = pnand %p191_p1, %p188_p0 }
   0x7   :  { %196 = shalt.err (!%p193_p2)
}
   0x8   :  { %s197_s15 = scalar_lea.vmem %s15_s7, 256  ;;  %p202_p4 = scmp.lt.s32.totalorder %s15_s7, %s15_s7 }
   0x9   :  { %p198_p3 = scmp.ne.s32.totalorder %s15_s7, %s197_s15  ;;  %p203_p5 = scmp.lt.s32.totalorder %s197_s15, %s197_s15 }
   0xb   :  { %p204_p6 = por %p203_p5, %p202_p4 }
   0xd   :  { %p205_p7 = pnand %p204_p6, %p198_p3 }
   0xf   :  { %208 = shalt.err (!%p205_p7)
}
  0x10   :  { %17 = dma.hbm_to_vmem [thread:$0]  %s287_s0, 256, %s15_s7, [#allocation4]  }
  0x11   :  { %231 = dma.done.wait [#allocation4], 256  }
  0x12   :  { %232 = vsyncadd [#allocation4], 4294967040  ;;  %v44_v0 = vlaneseq  ;;  %v27_v5 = vld [vmem:[#allocation3] sm:$0xff]  ;;  %vm124_vm0 = vcmask 1040384   ;;  %v28_v19 = vld [vmem:[#allocation3 + $0x8] sm:$0xff]  ;;  %s236_s0 = smov [#allocation6]  }
  0x13   :  { %v29_v6 = vand.u32 2147483647, %v27_v5  ;;  %v30_v25 = vand.u32 2147483647, %v28_v19  ;;  %s174_s18 = sshll.u32 %s236_s0, 4  ;;  %vm166_vm1 = vcmask 0   ;;  %s175_s18 = int_to_ptr.vmem [resolvable:$true] %s174_s18 }
  0x14   :  { %v45_v1 = vshrl.u32 %v44_v0, 7  ;;  %s209_s20 = scalar_lea.vmem %s175_s18, 16  ;;  %s213_s21 = scalar_lea.vmem %s175_s18, 32 }
  0x15   :  { %p210_p8 = scmp.ne.s32.totalorder %s175_s18, %s209_s20  ;;  %p214_p9 = scmp.lt.s32.totalorder %s175_s18, %s175_s18 }
  0x16   :  { %v46_v2 = vsub.s32 0, %v45_v1  ;;  %v50_v3 = vsub.s32 1, %v45_v1  ;;  %v54_v4 = vsub.s32 2, %v45_v1  ;;  %v58_v7 = vsub.s32 3, %v45_v1  ;;  %p215_p10 = scmp.lt.s32.totalorder %s213_s21, %s209_s20 }
  0x17   :  { %v62_v11 = vsub.s32 4, %v45_v1  ;;  %v66_v13 = vsub.s32 5, %v45_v1  ;;  %v70_v14 = vsub.s32 6, %v45_v1  ;;  %v74_v22 = vsub.s32 7, %v45_v1 }
  0x18   :  { %v47_v8 = vrot.slane %v29_v6, %v46_v2  ;;  %v51_v9 = vrot.slane %v29_v6, %v50_v3  ;;  %v55_v10 = vrot.slane %v29_v6, %v54_v4  ;;  %v59_v12 = vrot.slane %v29_v6, %v58_v7  ;;  %p216_p11 = por %p215_p10, %p214_p9 }
  0x19   :  { %v63_v15 = vrot.slane %v29_v6, %v62_v11  ;;  %v67_v21 = vrot.slane %v29_v6, %v66_v13  ;;  %v71_v26 = vrot.slane %v29_v6, %v70_v14  ;;  %v75_v29 = vrot.slane %v29_v6, %v74_v22 }
  0x1a   :  { %v125_v16 = vsel %vm124_vm0, %v47_v8, 0.0  ;;  %v126_v17 = vsel %vm124_vm0, %v51_v9, 0.0  ;;  %v128_v18 = vsel %vm124_vm0, %v55_v10, 0.0  ;;  %v130_v23 = vsel %vm124_vm0, %v59_v12, 0.0  ;;  %p217_p12 = pnand %p216_p11, %p210_p8 }
  0x1b   :  { %v127_v20 = vadd.f32 %v126_v17, %v125_v16  ;;  %v132_v27 = vsel %vm124_vm0, %v63_v15, 0.0  ;;  %v134_v30 = vsel %vm124_vm0, %v67_v21, 0.0  ;;  %v79_v32 = vrot.slane %v30_v25, %v46_v2 }
  0x1c   :  { %v136_v33 = vsel %vm124_vm0, %v71_v26, 0.0  ;;  %v83_v35 = vrot.slane %v30_v25, %v50_v3  ;;  %v138_v36 = vsel %vm124_vm0, %v75_v29, 0.0  ;;  %v87_v38 = vrot.slane %v30_v25, %v54_v4 }
  0x1d   :  { %v129_v24 = vadd.f32 %v128_v18, %v127_v20  ;;  %v140_v39 = vsel %vm124_vm0, %v79_v32, 0.0  ;;  %v91_v41 = vrot.slane %v30_v25, %v58_v7  ;;  %v95_v44 = vrot.slane %v30_v25, %v62_v11 }
  0x1e   :  { %v142_v42 = vsel %vm124_vm0, %v83_v35, 0.0  ;;  %v144_v45 = vsel %vm124_vm0, %v87_v38, 0.0  ;;  %v99_v47 = vrot.slane %v30_v25, %v66_v13  ;;  %v103_v50 = vrot.slane %v30_v25, %v70_v14 }
  0x1f   :  { %v131_v28 = vadd.f32 %v130_v23, %v129_v24  ;;  %v146_v48 = vsel %vm124_vm0, %v91_v41, 0.0  ;;  %v148_v51 = vsel %vm124_vm0, %v95_v44, 0.0  ;;  %v107_v53 = vrot.slane %v30_v25, %v74_v22 }
  0x20   :  { %v150_v54 = vsel %vm124_vm0, %v99_v47, 0.0  ;;  %v152_v56 = vsel %vm124_vm0, %v103_v50, 0.0 }
  0x21   :  { %v133_v31 = vadd.f32 %v132_v27, %v131_v28  ;;  %v154_v58 = vsel %vm124_vm0, %v107_v53, 0.0 }
  0x23   :  { %v135_v34 = vadd.f32 %v134_v30, %v133_v31 }
  0x25   :  { %v137_v37 = vadd.f32 %v136_v33, %v135_v34 }
  0x27   :  { %v139_v40 = vadd.f32 %v138_v36, %v137_v37 }
  0x29   :  { %v141_v43 = vadd.f32 %v140_v39, %v139_v40 }
  0x2b   :  { %v143_v46 = vadd.f32 %v142_v42, %v141_v43 }
  0x2d   :  { %v145_v49 = vadd.f32 %v144_v45, %v143_v46 }
  0x2f   :  { %v147_v52 = vadd.f32 %v146_v48, %v145_v49 }
  0x31   :  { %v149_v55 = vadd.f32 %v148_v51, %v147_v52 }
  0x33   :  { %v151_v57 = vadd.f32 %v150_v54, %v149_v55 }
  0x35   :  { %v153_v59 = vadd.f32 %v152_v56, %v151_v57 }
  0x37   :  { %v155_v60 = vadd.f32 %v154_v58, %v153_v59 }
  0x39   :  { %156 = vadd.xlane.f32.xlu0 %v155_v60 }
  0xc6   :  { %v157_v61 = vpop.xlane.xlu0 %156 }
  0xc7   :  { %v158_v62 = vrot.slane %v157_v61, 4 }
  0xc9   :  { %v159_v63 = vadd.f32 %v158_v62, %v157_v61 }
  0xcb   :  { %v160_v0 = vrot.slane %v159_v63, 2 }
  0xcd   :  { %v161_v1 = vadd.f32 %v160_v0, %v159_v63 }
  0xcf   :  { %v162_v2 = vrot.slane %v161_v1, 1 }
  0xd1   :  { %v163_v3 = vadd.f32 %v162_v2, %v161_v1 }
  0xd3   :  { %183 = vpush %v163_v3 }
 0x104   :  { %s184_s19 = spop %183 }
 0x105   :  { %v165_v4 = vstv %s184_s19 }
 0x106   :  { %167 = vst.msk [vmem:[#allocation6] sm:$0x1] %vm166_vm1, %v165_v4 }
 0x107   :  { %220 = shalt.err (!%p217_p12)
}
 0x108   :  { %s221_s24 = scalar_lea.hbm %s288_s1, 16 }
 0x109   :  { %p222_p13 = scmp.ne.s32.totalorder %s288_s1, %s221_s24  ;;  %p225_p0 = scmp.lt.u32.totalorder %s221_s24, %s288_s1 }
 0x10b   :  { %p227_p1 = pnand %p225_p0, %p222_p13 }
 0x10d   :  { %230 = shalt.err (!%p227_p1)
}
 0x10e   :  { %177 = dma.vmem_to_hbm [thread:$0]  %s175_s18, 16, %s288_s1, [#allocation5]  }
 0x10f   :  { %233 = dma.done.wait [#allocation5], 16  }
 0x110   :  { %234 = vsyncadd [#allocation5], 4294967280 }
 0x111   :  { %181 = vsyncpa [#allocation4], 1 }
 0x112   :  { %182 = vsyncpa [#allocation5], 1 }

</bundles_post_ra>
